<compile_context>
chip_gen: v6e
topology: v6e:2x2x1
jax: 0.10.0
libtpu: 0.0.40
codegen_flags: <defaults>
</compile_context>

<pallas_src>
import jax
import jax.numpy as jnp
from jax.experimental import pallas as pl
from jax.experimental.pallas import tpu as pltpu


def patch_embed_kernel(x_ref, w_ref, cls_ref, pos_ref, o_ref):
    # x_ref  : (Bt, Np, K)    bf16  patch pixels for this batch tile (streamed)
    # w_ref  : (K, E)         bf16  projection weight                (resident)
    # cls_ref: (1, E)         f32   cls_token + pos[0]               (resident)
    # pos_ref: (Np, E)        f32   pos[1:] + conv bias              (resident)
    # o_ref  : (Bt, Np+1, E)  out dtype (bf16 by default)
    bt, n_p, _ = x_ref.shape
    e = w_ref.shape[1]

    # cls row for every image in the tile — one aligned store at token 0.
    # (broadcast hoisted out of the loop; JAX does not CSE broadcast_in_dim)
    o_ref[:, 0:1, :] = jnp.broadcast_to(
        cls_ref[...][None], (bt, 1, e)).astype(o_ref.dtype)

    w = w_ref[...]
    pos = pos_ref[...]

    # Static per-image loop: Bt plain 2-D MXU matmuls — avoids the
    # (Bt, Np) -> (Bt*Np) collapse that would force a VMEM relayout (Np is
    # not sublane-pack aligned).  f32 accumulate + f32 pos add, cast at store.
    for b in range(bt):
        proj = jnp.dot(x_ref[b], w, preferred_element_type=jnp.float32)  # (Np, E)
        o_ref[b, 1:, :] = (proj + pos).astype(o_ref.dtype)


def _pick_batch_tile(B, Np, K, E, out_itemsize, x_itemsize=2):
    """Batch-tile size.

    Targets ~1024-2048 matmul rows per grid step (amortizes the ~0.35us fixed
    per-step overhead), keeps the double-buffered in+out blocks under ~40 MiB
    (v7x physical VMEM is only 64 MiB), and prefers an even grid length >= 2
    so both v7x TensorCores get balanced work.
    """
    budget = 40 * 1024 * 1024

    def step_bytes(bt):
        return 2 * (bt * Np * K * x_itemsize + bt * (Np + 1) * E * out_itemsize)

    divisors = [d for d in range(1, B + 1) if B % d == 0]
    cands = [d for d in divisors if d * Np <= 2048 and step_bytes(d) <= budget]
    if not cands:
        cands = [1]
    even = [d for d in cands if (B // d) >= 2 and (B // d) % 2 == 0]
    multi = [d for d in cands if (B // d) >= 2]
    pool = even or multi or cands
    return max(pool)


def patch_embedding(x, w_conv, b_conv, cls_token, pos_embedding, patch_size,
                    batch_tile=None, out_dtype=jnp.bfloat16):
    """x: (B, C, H, W) float32. Returns (B, num_patches + 1, embed_dim) out_dtype."""
    B, C, H, W = x.shape
    p = patch_size
    Hp, Wp = H // p, W // p
    Np = Hp * Wp
    E = w_conv.shape[0]
    K = C * p * p

    out_itemsize = jnp.dtype(out_dtype).itemsize
    Bt = batch_tile if batch_tile is not None else _pick_batch_tile(
        B, Np, K, E, out_itemsize)
    assert B % Bt == 0, "batch tile must divide batch"

    # NCHW -> per-patch vectors ordered (c, i, j) to match the Conv2d weight
    # layout (E, C, p, p); the bf16 cast is fused into the same XLA op so the
    # materialized copy is half-width.
    # TODO(synk): an upstream patch-major bf16 producer would remove this
    # extra HBM pass entirely (biggest remaining traffic item).
    patches = x.reshape(B, C, Hp, p, Wp, p).transpose(0, 2, 4, 1, 3, 5)
    patches = patches.reshape(B, Np, K).astype(jnp.bfloat16)

    w_mat = w_conv.reshape(E, K).T.astype(jnp.bfloat16)                  # (K, E)

    pos = pos_embedding.reshape(Np + 1, E).astype(jnp.float32)
    cls_row = (cls_token.reshape(1, E) + pos[0:1]).astype(jnp.float32)   # (1, E)
    pos_fused = (pos[1:] + b_conv.reshape(1, E)).astype(jnp.float32)     # (Np, E)

    # NOTE: real ViT dims (K = E = 768) are lane-aligned; the toy demo dims
    # (E=32, K=64) are not, so perf on the toy config is meaningless.
    # NOTE: the resident w/cls/pos blocks could be single-buffered
    # (pipeline_mode=pl.Buffered(1)) to reclaim ~2 MB on v7x at Bt=16; left at
    # the default for lowering robustness.
    out = pl.pallas_call(
        patch_embed_kernel,
        out_shape=jax.ShapeDtypeStruct((B, Np + 1, E), out_dtype),
        grid_spec=pltpu.PrefetchScalarGridSpec(
            num_scalar_prefetch=0,
            grid=(B // Bt,),
            in_specs=[
                pl.BlockSpec((Bt, Np, K), lambda b: (b, 0, 0)),   # streamed
                pl.BlockSpec((K, E), lambda b: (0, 0)),           # resident
                pl.BlockSpec((1, E), lambda b: (0, 0)),           # resident
                pl.BlockSpec((Np, E), lambda b: (0, 0)),          # resident
            ],
            out_specs=pl.BlockSpec((Bt, Np + 1, E), lambda b: (b, 0, 0)),
        ),
        compiler_params=pltpu.CompilerParams(
            dimension_semantics=("parallel",),
            # Review cap for v7x (64 MiB physical); Bt selection keeps the
            # double-buffered blocks well under this.
            vmem_limit_bytes=48 * 1024 * 1024,
        ),
    )(patches, w_mat, cls_row, pos_fused)
    return out


if __name__ == "__main__":
    # Small shapes consistent with the module: img=16, patch=4, C=4, E=32, B=2.
    B, C, img_size, patch_size, embed_dim = 2, 4, 16, 4, 32
    num_patches = (img_size // patch_size) ** 2

    key = jax.random.PRNGKey(0)
    kx, kw, kb, kc, kp = jax.random.split(key, 5)

    x = jax.random.normal(kx, (B, C, img_size, img_size), dtype=jnp.float32)
    w_conv = jax.random.normal(
        kw, (embed_dim, C, patch_size, patch_size), dtype=jnp.float32) * 0.02
    b_conv = jax.random.normal(kb, (embed_dim,), dtype=jnp.float32) * 0.02
    cls_token = jax.random.normal(kc, (1, 1, embed_dim), dtype=jnp.float32) * 0.02
    pos_embedding = jax.random.normal(
        kp, (1, num_patches + 1, embed_dim), dtype=jnp.float32) * 0.02

    out = patch_embedding(x, w_conv, b_conv, cls_token, pos_embedding, patch_size)
    out = jax.block_until_ready(out)

    # Pure-JAX f32 reference (strided conv == patch-extract + matmul).
    ref_proj = jax.lax.conv_general_dilated(
        x, w_conv, window_strides=(patch_size, patch_size), padding="VALID",
        dimension_numbers=("NCHW", "OIHW", "NCHW"))
    ref_proj = ref_proj + b_conv.reshape(1, embed_dim, 1, 1)
    ref_proj = ref_proj.reshape(B, embed_dim, num_patches).transpose(0, 2, 1)
    ref_cls = jnp.broadcast_to(cls_token, (B, 1, embed_dim))
    ref = jnp.concatenate([ref_cls, ref_proj], axis=1) + pos_embedding

    assert out.shape == (B, num_patches + 1, embed_dim)
    assert out.dtype == jnp.bfloat16
    # bf16 matmul operands + bf16 output -> loosened tolerance vs f32 reference.
    assert jnp.allclose(out.astype(jnp.float32), ref, atol=2e-2, rtol=2e-2)
    print("KERNEL_OK")
</pallas_src>

<mosaic_0001>
module attributes {stable_mosaic.version = 11 : i64} {
  func.func @patch_embed_kernel(%arg0: i32, %arg1: memref<1x16x64xbf16, #tpu.memory_space<vmem>>, %arg2: memref<64x32xbf16, #tpu.memory_space<vmem>>, %arg3: memref<1x32xf32, #tpu.memory_space<vmem>>, %arg4: memref<16x32xf32, #tpu.memory_space<vmem>>, %arg5: memref<1x17x32xbf16, #tpu.memory_space<vmem>>) attributes {dimension_semantics = [#tpu.dimension_semantics<parallel>], iteration_bounds = array<i64: 2>, scalar_prefetch = 0 : i64, scratch_operands = 0 : i64, tpu.core_type = #tpu.core_type<tc>, window_params = [{transform_indices = @transform_0, window_bounds = array<i64: 1, 16, 64>}, {pipeline_mode = #tpu.pipeline_mode<synchronous>, transform_indices = @transform_1, window_bounds = array<i64: 64, 32>}, {pipeline_mode = #tpu.pipeline_mode<synchronous>, transform_indices = @transform_2, window_bounds = array<i64: 1, 32>}, {pipeline_mode = #tpu.pipeline_mode<synchronous>, transform_indices = @transform_3, window_bounds = array<i64: 16, 32>}, {transform_indices = @transform_4, window_bounds = array<i64: 1, 17, 32>}]} {
    %c0 = arith.constant 0 : index
    %c0_0 = arith.constant 0 : index
    %0 = vector.load %arg3[%c0, %c0_0] : memref<1x32xf32, #tpu.memory_space<vmem>>, vector<1x32xf32>
    %1 = vector.shape_cast %0 : vector<1x32xf32> to vector<1x1x32xf32>
    %2 = arith.truncf %1 : vector<1x1x32xf32> to vector<1x1x32xbf16>
    %c0_1 = arith.constant 0 : index
    %c0_2 = arith.constant 0 : index
    %c0_3 = arith.constant 0 : index
    %3 = vector.load %arg5[%c0_1, %c0_2, %c0_3] : memref<1x17x32xbf16, #tpu.memory_space<vmem>>, vector<1x1x32xbf16>
    tpu.vector_store %arg5[%c0_1, %c0_2, %c0_3], %2 {strides = array<i32>} : memref<1x17x32xbf16, #tpu.memory_space<vmem>>, vector<1x1x32xbf16>,
    %c0_4 = arith.constant 0 : index
    %c0_5 = arith.constant 0 : index
    %4 = vector.load %arg2[%c0_4, %c0_5] : memref<64x32xbf16, #tpu.memory_space<vmem>>, vector<64x32xbf16>
    %c0_6 = arith.constant 0 : index
    %c0_7 = arith.constant 0 : index
    %5 = vector.load %arg4[%c0_6, %c0_7] : memref<16x32xf32, #tpu.memory_space<vmem>>, vector<16x32xf32>
    %c0_8 = arith.constant 0 : index
    %c0_9 = arith.constant 0 : index
    %c0_10 = arith.constant 0 : index
    %6 = vector.load %arg1[%c0_8, %c0_9, %c0_10] : memref<1x16x64xbf16, #tpu.memory_space<vmem>>, vector<1x16x64xbf16>
    %7 = vector.shape_cast %6 : vector<1x16x64xbf16> to vector<16x64xbf16>
    %cst = arith.constant dense<0.000000e+00> : vector<16x32xf32>
    %8 = tpu.matmul %7, %4, %cst {dimension_numbers = #tpu.dot_dimension_numbers<[1], [0], [0], [1], [0, 0, 1, 1], [], []>} : vector<16x64xbf16>, vector<64x32xbf16>, vector<16x32xf32> -> vector<16x32xf32>
    %9 = arith.addf %8, %5 : vector<16x32xf32>
    %10 = arith.truncf %9 : vector<16x32xf32> to vector<16x32xbf16>
    %c0_11 = arith.constant 0 : index
    %c1 = arith.constant 1 : index
    %c0_12 = arith.constant 0 : index
    %11 = vector.load %arg5[%c0_11, %c1, %c0_12] : memref<1x17x32xbf16, #tpu.memory_space<vmem>>, vector<1x16x32xbf16>
    %12 = vector.shape_cast %11 : vector<1x16x32xbf16> to vector<16x32xbf16>
    %13 = vector.shape_cast %10 : vector<16x32xbf16> to vector<1x16x32xbf16>
    tpu.vector_store %arg5[%c0_11, %c1, %c0_12], %13 {strides = array<i32>} : memref<1x17x32xbf16, #tpu.memory_space<vmem>>, vector<1x16x32xbf16>,
    return
  }
  func.func @transform_0(%arg0: i32) -> (i32, i32, i32) {
    %c0_i32 = arith.constant 0 : i32
    %c0_i32_0 = arith.constant 0 : i32
    %c0_i32_1 = arith.constant 0 : i32
    return %arg0, %c0_i32, %c0_i32_0 : i32, i32, i32
  }
  func.func @transform_1(%arg0: i32) -> (i32, i32) {
    %c0_i32 = arith.constant 0 : i32
    %c0_i32_0 = arith.constant 0 : i32
    %c0_i32_1 = arith.constant 0 : i32
    return %c0_i32, %c0_i32_0 : i32, i32
  }
  func.func @transform_2(%arg0: i32) -> (i32, i32) {
    %c0_i32 = arith.constant 0 : i32
    %c0_i32_0 = arith.constant 0 : i32
    %c0_i32_1 = arith.constant 0 : i32
    return %c0_i32, %c0_i32_0 : i32, i32
  }
  func.func @transform_3(%arg0: i32) -> (i32, i32) {
    %c0_i32 = arith.constant 0 : i32
    %c0_i32_0 = arith.constant 0 : i32
    %c0_i32_1 = arith.constant 0 : i32
    return %c0_i32, %c0_i32_0 : i32, i32
  }
  func.func @transform_4(%arg0: i32) -> (i32, i32, i32) {
    %c0_i32 = arith.constant 0 : i32
    %c0_i32_0 = arith.constant 0 : i32
    %c0_i32_1 = arith.constant 0 : i32
    return %arg0, %c0_i32, %c0_i32_0 : i32, i32, i32
  }
}

</mosaic_0001>

<bundles_post_ra>
// kernel: tpu_custom_call.1
= control target key start
LH: loop header
LB: loop body
LE: loop exit
PB: predicated region body
PF: predicated region fallthrough
CT: control target
= control target key end

     0   :  { %s476_s15 = smov 0   ;;  %s535_s0 = inlined_call_operand.vmem [shape: bf16[2,16,64], index: 0, kind: input, shape index: {}]   ;;  %s536_s1 = inlined_call_operand.vmem [shape: bf16[64,32], index: 1, kind: input, shape index: {}]   ;;  %s537_s2 = inlined_call_operand.vmem [shape: f32[1,32], index: 2, kind: input, shape index: {}]   ;;  %s538_s3 = inlined_call_operand.vmem [shape: f32[16,32], index: 3, kind: input, shape index: {}]   ;;  %s539_s4 = inlined_call_operand.vmem [shape: bf16[2,17,32], index: 4, kind: output, shape index: {}]  }
   0x1 LB: > { %s387_s16 = sadd.s32 4294967295, %s447_s15   ;;  %p391_p0 = scmp.ge.s32.totalorder %s447_s15, 1  ;;  %s447_s15 = sphi %s476_s15, %s14_s15  }
   0x2   : > { %p162_p1 = scmp.lt.s32.totalorder %s447_s15, 3 }
   0x4   : > { %p163_p2 = pnand %p391_p0, %p162_p1 }
   0x5   : > { %p188_p3 = scmp.lt.s32.totalorder (!%p163_p2), %s387_s16, 1 }
   0x6   : > { %166 = sbr.rel (%p163_p2) target bundleno = 237 (0xed), region = 36 }
   0xb   : > { %v436_v0 = vld [vmem:[%s536_s1 + $0x18] sm:$0xff]   ;;  %v449_v1 = vmov 0.0   ;;  %v437_v2 = vld [vmem:[%s536_s1 + $0x10] sm:$0xff]   ;;  %vm450_vm0 = vmmov 0   ;;  %s543_s16 = smov (!%p188_p3, %s387_s16), 1  ;;  %vm201_vm1 = vcmask 253952  }
   0xc   : > { %413 = vmatprep.subr.bf16.mxu0 %v449_v1  ;;  %421 = vmatprep.mubr.msk.bf16.mxu0 %vm450_vm0, %v449_v1  ;;  %v199_v3 = vld [vmem:[%s537_s2] sm:$0x1]  ;;  %vm202_vm2 = vsmask.f32 256  ;;  %v438_v4 = vld [vmem:[%s536_s1 + $0x8] sm:$0xff]   ;;  %s405_s25 = sshll.u32 %s543_s16, 3 }
   0xd   : > { %414 = vmatpush3.bf16.msra.mxu0 %v436_v0  ;;  %s425_s26 = smul.u32 12, %s543_s16  ;;  %v200_v5 = vpack.c.bf16 %v199_v3, %v199_v3  ;;  %s192_s29 = scalar_lea.vmem %s535_s0, %s405_s25  ;;  %vm500_vm3 = vmand %vm201_vm1, %vm202_vm2  ;;  %v439_v8 = vld [vmem:[%s536_s1] sm:$0xff]   ;;  %vm248_vm4 = vcmask 523264   ;;  %v216_v15 = vld [vmem:[%s538_s3 + $0x8] sm:$0xff]  ;;  %vm321_vm5 = vcmask 257024  }
   0xe   : > { %415 = vmatprep.subr.bf16.mxu0 %v449_v1  ;;  %v440_v10 = vld [vmem:[%s192_s29] sm:$0xff]   ;;  %vm322_vm6 = vsmask.f32 7938  ;;  %vm299_vm8 = vsmask.f32 4368 }
   0xf   : > { %s507_s6 = scalar_lea.vmem %s539_s4, %s425_s26  ;;  %v215_v11 = vld [vmem:[%s538_s3] sm:$0xff]  ;;  %vm323_vm7 = vmand %vm321_vm5, %vm322_vm6 }
  0x10   : > { %v204_v7 = vld [vmem:[%s507_s6] sm:$0x1]  ;;  %vm300_vm9 = vmor %vm202_vm2, %vm299_vm8  ;;  %v329_v30 = vld [vmem:[%s507_s6 + $0x8] sm:$0x1] }
  0x11   : > { %416 = vmatpush3.bf16.msra.mxu0 %v437_v2  ;;  %v205_v9 = vsel %vm500_vm3, %v200_v5, %v204_v7 }
  0x12   : > { %417 = vmatprep.subr.bf16.mxu0 %v449_v1  ;;  %206 = vst [vmem:[%s507_s6] sm:$0x1] %v205_v9 }
  0x15   : > { %418 = vmatpush3.bf16.msra.mxu0 %v438_v4 }
  0x16   : > { %419 = vmatprep.subr.bf16.mxu0 %v449_v1 }
  0x19   : > { %420 = vmatpush3.bf16.msra.mxu0 %v439_v8  ;;  %v324_v24 = vld [vmem:[%s507_s6] sm:$0xf] }
  0x1c   : > { %422 = vmatmul.mubr.msk.bf16.vlgmr.msra.gmra.mxu0 %vm248_vm4, %v440_v10 }
  0xdc   : > { %v286_v12 = vpop.f32.mrf.mxu0 }
  0xdd   : > { %v287_v13 = vadd.f32 %v286_v12, %v215_v11 }
  0xde   : > { %v423_v14 = vpop.f32.mrf.mxu0 }
  0xdf   : > { %v406_v16 = vpack.c.bf16 %v287_v13, %v287_v13 }
  0xe0   : > { %v289_v17 = vpop.f32.mrf.mxu0 }
  0xe1   : > { %v302_v18 = vshrl.u32 %v406_v16, 16  ;;  %v290_v19 = vadd.f32 %v289_v17, %v216_v15  ;;  %v305_v22 = vshll.u32 %v406_v16, 16 }
  0xe2   : > { %v424_v20 = vpop.f32.mrf.mxu0 }
  0xe3   : > { %v304_v21 = vrot.slane %v302_v18, 7  ;;  %v407_v23 = vpack.c.bf16 %v290_v19, %v290_v19 }
  0xe5   : > { %v307_v25 = vor.u32 %v305_v22, %v304_v21  ;;  %v310_v26 = vshrl.u32 %v407_v23, 16  ;;  %v313_v29 = vshll.u32 %v407_v23, 16  ;;  %v308_v31 = vrot.slane %v304_v21, 4 }
  0xe7   : > { %v325_v27 = vsel %vm323_vm7, %v307_v25, %v324_v24  ;;  %v312_v28 = vrot.slane %v310_v26, 7 }
  0xe8   : > { %326 = vst [vmem:[%s507_s6] sm:$0xf] %v325_v27 }
  0xe9   : > { %v315_v32 = vor.u32 %v313_v29, %v312_v28  ;;  %v317_v33 = vrot.slane %v312_v28, 4 }
  0xeb   : > { %v316_v34 = vsel %vm300_vm9, %v308_v31, %v315_v32  ;;  %v330_v35 = vsel %vm500_vm3, %v317_v33, %v329_v30 }
  0xec   : > { %328 = vst.msk [vmem:[%s507_s6 + $0x4] sm:$0xf] %vm321_vm5, %v316_v34  ;;  %331 = vst [vmem:[%s507_s6 + $0x8] sm:$0x1] %v330_v35 }
  0xed PF: > { %s14_s15 = sadd.s32 1, %s447_s15  }
  0xee   : > { %p11_p4 = scmp.ge.s32.totalorder %s14_s15, 4  }
  0xf0   :  { %13 = sbr.rel (!%p11_p4) target bundleno = 1 (0x1), region = 66 }

</bundles_post_ra>
